<compile_context>
chip_gen: v5e
topology: v5e:2x2
jax: 0.10.0
libtpu: 0.0.40
codegen_flags: <defaults>
</compile_context>

<pallas_src>
import math

import jax
import jax.numpy as jnp
from jax.experimental import pallas as pl
from jax.experimental.pallas import tpu as pltpu


# ------------------------------ helpers -------------------------------------


def _round_up(x, m):
    return -(-x // m) * m


# ----------------------------- Pallas kernel --------------------------------


def _build_kernel(conv_dims, out_dim, n_nodes, offsets):
    """Builds the fused forward kernel (all static shapes captured by closure).

    conv_dims : list of (f_in, f_out) for the conv layers
    out_dim   : (f_last, f_out) of the output Linear
    offsets   : per packed-slab piece, (row_start, rows, cols); order is
                [conv W^T ..., W_out^T, bias-broadcast]
    """
    fout = out_dim[1]

    def kernel(at_ref, cucv_ref, xt_ref, slab_ref, out_ref):
        # at_ref  : (N, N)   = A^T  (so aggregation is  H^T @ A^T)
        # cucv    : (2, N)   row 0 = cu, row 1 = cv   (lane vectors)
        # xt_ref  : (F0, N)  = feat^T (nodes on the 128-lane axis)
        # slab    : packed parameters, sliced with static pl.ds below
        at = at_ref[...]                          # hoisted: read A^T once
        cu_row = cucv_ref[pl.ds(0, 1), :]         # (1, N)
        cv_row = cucv_ref[pl.ds(1, 1), :]         # (1, N)

        x = xt_ref[...]                           # (F, N)

        # Conv layers (transposed):  X <- relu( cv * ((cu * (W^T @ X)) @ A^T) )
        # When f_in < f_out, reassociate so the NxN aggregation runs at the
        # narrower width (fewer MXU pushes); relu is outside, so it is exact
        # up to FP reassociation.
        for li, (fin, fo) in enumerate(conv_dims):
            r0, _, _ = offsets[li]
            wt = slab_ref[pl.ds(r0, fo), pl.ds(0, fin)]            # (fo, fin) = W^T
            if fin < fo:
                agg = jnp.dot(x * cu_row, at,
                              preferred_element_type=jnp.float32) * cv_row
                h = jnp.dot(wt, agg, preferred_element_type=jnp.float32)
            else:
                h = jnp.dot(wt, x, preferred_element_type=jnp.float32)
                h = jnp.dot(h * cu_row, at,
                            preferred_element_type=jnp.float32) * cv_row
            x = jnp.maximum(h, 0.0)

        # Output Linear + sigmoid epilogue (EUP slot is effectively free).
        r0, _, f_last = offsets[len(conv_dims)]
        wout_t = slab_ref[pl.ds(r0, fout), pl.ds(0, f_last)]       # (fout, f_last)
        rb0, _, _ = offsets[len(conv_dims) + 1]
        bias = slab_ref[pl.ds(rb0, fout), pl.ds(0, n_nodes)]       # (fout, N)
        y = jnp.dot(wout_t, x, preferred_element_type=jnp.float32) + bias
        out_ref[...] = jax.nn.sigmoid(y)          # (fout, N): lane-dense store

    return kernel


# ------------------------------- wrapper -------------------------------------


def influence_encoder(A, feat, cu, cv, conv_weights, out_w, out_b):
    """Full InfluenceEncoder forward (same graph for every conv layer).

    A            : (N, N)  dense adjacency, A[v, u] = w(u -> v)
    feat         : (N, F0) node features
    cu, cv       : (N, 1)  per-node scalars (src / dst)
    conv_weights : list of (F_i, F_{i+1}) conv weight matrices
    out_w        : (F_last, F_out) output Linear weight (pre-transposed)
    out_b        : (F_out,) output Linear bias

    Returns (N, F_out) node embeddings (original node-major orientation).
    """
    N, _ = feat.shape
    f_last, fout = out_w.shape
    conv_dims = [tuple(w.shape) for w in conv_weights]

    # ---- node-major -> feature-major (nodes on the 128-lane axis) ----------
    at = jnp.asarray(A, jnp.float32).T                        # (N_src, N_dst)
    xt = jnp.asarray(feat, jnp.float32).T                     # (F0, N)
    cucv = jnp.stack(
        [jnp.reshape(jnp.asarray(cu, jnp.float32), (N,)),
         jnp.reshape(jnp.asarray(cv, jnp.float32), (N,))], axis=0)   # (2, N)

    # ---- pack all small parameters into one lane-padded slab (1 DMA) -------
    pieces = [jnp.asarray(w, jnp.float32).T for w in conv_weights]   # (fo, fin)
    pieces.append(jnp.asarray(out_w, jnp.float32).T)                 # (fout, f_last)
    pieces.append(jnp.broadcast_to(
        jnp.reshape(jnp.asarray(out_b, jnp.float32), (fout, 1)), (fout, N)))
    lane_w = _round_up(max([128, N] + [p.shape[1] for p in pieces]), 128)

    offsets, blocks, row = [], [], 0
    for p in pieces:
        r, c = p.shape
        r_pad = _round_up(r, 8)                    # keep every piece sublane-aligned
        blk = jnp.zeros((r_pad, lane_w), jnp.float32).at[:r, :c].set(p)
        offsets.append((row, r, c))
        blocks.append(blk)
        row += r_pad
    slab = jnp.concatenate(blocks, axis=0)         # (128, 128) at the demo sizes

    kernel = _build_kernel(conv_dims, (f_last, fout), N, offsets)

    out_t = pl.pallas_call(
        kernel,
        out_shape=jax.ShapeDtypeStruct((fout, N), jnp.float32),
        in_specs=[pl.BlockSpec(memory_space=pltpu.MemorySpace.VMEM)] * 4,
        out_specs=pl.BlockSpec(memory_space=pltpu.MemorySpace.VMEM),
    )(at, cucv, xt, slab)

    return out_t.T                                 # back to (N, fout) semantics


# ------------------------- deterministic params -------------------------------


def xavier_uniform(key, fan_in, fan_out):
    limit = math.sqrt(6.0 / (fan_in + fan_out))
    return jax.random.uniform(
        key, (fan_in, fan_out), jnp.float32, minval=-limit, maxval=limit
    )


# --------------------------------- main ---------------------------------------

if __name__ == "__main__":
    key = jax.random.PRNGKey(0)
    N = 128                      # number of graph nodes
    units = [32, 64, 32, 16]     # -> conv (32,64), conv (64,32), Linear(32,16)

    keys = jax.random.split(key, 8)

    # Graph data: dense adjacency (A[v,u] = w(u->v)), per-node cu / cv scalars.
    A = jax.random.uniform(keys[0], (N, N), jnp.float32) / N
    cu = jax.random.uniform(keys[1], (N, 1), jnp.float32)
    cv = jax.random.uniform(keys[2], (N, 1), jnp.float32)
    feat = jax.random.normal(keys[3], (N, units[0]), jnp.float32)

    # Conv layer weights (xavier uniform, as reset_parameters does).
    dims = list(zip(units[:-1], units[1:]))
    conv_dims, out_dim = dims[:-1], dims[-1]
    conv_weights = [
        xavier_uniform(keys[4 + i], fi, fo) for i, (fi, fo) in enumerate(conv_dims)
    ]
    # Output Linear: weight xavier-uniform (stored transposed as (fin, fout)),
    # bias keeps nn.Linear default U(-1/sqrt(fan_in), 1/sqrt(fan_in)).
    out_w = xavier_uniform(keys[6], out_dim[0], out_dim[1])
    bb = 1.0 / math.sqrt(out_dim[0])
    out_b = jax.random.uniform(
        keys[7], (out_dim[1],), jnp.float32, minval=-bb, maxval=bb
    )

    out = influence_encoder(A, feat, cu, cv, conv_weights, out_w, out_b)
    out = jax.block_until_ready(out)

    # Pure-JAX reference with the original (unfolded, node-major) semantics.
    x = feat
    for W in conv_weights:
        x = jnp.maximum((A @ ((x @ W) * cu)) * cv, 0.0)
    ref = jax.nn.sigmoid(x @ out_w + out_b)

    assert out.shape == (N, units[-1])
    # Slightly looser than before: the layer-1 reassociation + cu/cv refold
    # change FP summation order (values are O(1), errors are ~1e-6).
    assert jnp.allclose(out, ref, atol=1e-4, rtol=1e-4), "mismatch vs reference"
    print("KERNEL_OK")
</pallas_src>

<mosaic_0001>
module attributes {stable_mosaic.version = 11 : i64} {
  func.func @kernel(%arg0: memref<128x128xf32, #tpu.memory_space<vmem>>, %arg1: memref<2x128xf32, #tpu.memory_space<vmem>>, %arg2: memref<32x128xf32, #tpu.memory_space<vmem>>, %arg3: memref<128x128xf32, #tpu.memory_space<vmem>>, %arg4: memref<16x128xf32, #tpu.memory_space<vmem>>) attributes {dimension_semantics = [], scalar_prefetch = 0 : i64, scratch_operands = 0 : i64, tpu.core_type = #tpu.core_type<tc>} {
    %c0 = arith.constant 0 : index
    %c0_0 = arith.constant 0 : index
    %0 = vector.load %arg0[%c0, %c0_0] : memref<128x128xf32, #tpu.memory_space<vmem>>, vector<128x128xf32>
    %c0_1 = arith.constant 0 : index
    %c0_2 = arith.constant 0 : index
    %1 = vector.load %arg1[%c0_1, %c0_2] : memref<2x128xf32, #tpu.memory_space<vmem>>, vector<1x128xf32>
    %c1 = arith.constant 1 : index
    %c0_3 = arith.constant 0 : index
    %2 = vector.load %arg1[%c1, %c0_3] : memref<2x128xf32, #tpu.memory_space<vmem>>, vector<1x128xf32>
    %c0_4 = arith.constant 0 : index
    %c0_5 = arith.constant 0 : index
    %3 = vector.load %arg2[%c0_4, %c0_5] : memref<32x128xf32, #tpu.memory_space<vmem>>, vector<32x128xf32>
    %c0_6 = arith.constant 0 : index
    %c0_7 = arith.constant 0 : index
    %4 = vector.load %arg3[%c0_6, %c0_7] : memref<128x128xf32, #tpu.memory_space<vmem>>, vector<64x32xf32>
    %5 = vector.broadcast %1 : vector<1x128xf32> to vector<32x128xf32>
    %6 = arith.mulf %3, %5 : vector<32x128xf32>
    %cst = arith.constant dense<0.000000e+00> : vector<32x128xf32>
    %7 = tpu.matmul %6, %0, %cst {dimension_numbers = #tpu.dot_dimension_numbers<[1], [0], [0], [1], [0, 0, 1, 1], [], []>} : vector<32x128xf32>, vector<128x128xf32>, vector<32x128xf32> -> vector<32x128xf32>
    %8 = vector.broadcast %2 : vector<1x128xf32> to vector<32x128xf32>
    %9 = arith.mulf %7, %8 : vector<32x128xf32>
    %cst_8 = arith.constant dense<0.000000e+00> : vector<64x128xf32>
    %10 = tpu.matmul %4, %9, %cst_8 {dimension_numbers = #tpu.dot_dimension_numbers<[1], [0], [0], [1], [0, 0, 1, 1], [], []>} : vector<64x32xf32>, vector<32x128xf32>, vector<64x128xf32> -> vector<64x128xf32>
    %cst_9 = arith.constant 0.000000e+00 : f32
    %11 = vector.broadcast %cst_9 : f32 to vector<64x128xf32>
    %12 = arith.maximumf %10, %11 : vector<64x128xf32>
    %c64 = arith.constant 64 : index
    %c0_10 = arith.constant 0 : index
    %13 = vector.load %arg3[%c64, %c0_10] : memref<128x128xf32, #tpu.memory_space<vmem>>, vector<32x64xf32>
    %cst_11 = arith.constant dense<0.000000e+00> : vector<32x128xf32>
    %14 = tpu.matmul %13, %12, %cst_11 {dimension_numbers = #tpu.dot_dimension_numbers<[1], [0], [0], [1], [0, 0, 1, 1], [], []>} : vector<32x64xf32>, vector<64x128xf32>, vector<32x128xf32> -> vector<32x128xf32>
    %15 = vector.broadcast %1 : vector<1x128xf32> to vector<32x128xf32>
    %16 = arith.mulf %14, %15 : vector<32x128xf32>
    %cst_12 = arith.constant dense<0.000000e+00> : vector<32x128xf32>
    %17 = tpu.matmul %16, %0, %cst_12 {dimension_numbers = #tpu.dot_dimension_numbers<[1], [0], [0], [1], [0, 0, 1, 1], [], []>} : vector<32x128xf32>, vector<128x128xf32>, vector<32x128xf32> -> vector<32x128xf32>
    %18 = vector.broadcast %2 : vector<1x128xf32> to vector<32x128xf32>
    %19 = arith.mulf %17, %18 : vector<32x128xf32>
    %cst_13 = arith.constant 0.000000e+00 : f32
    %20 = vector.broadcast %cst_13 : f32 to vector<32x128xf32>
    %21 = arith.maximumf %19, %20 : vector<32x128xf32>
    %c96 = arith.constant 96 : index
    %c0_14 = arith.constant 0 : index
    %22 = vector.load %arg3[%c96, %c0_14] : memref<128x128xf32, #tpu.memory_space<vmem>>, vector<16x32xf32>
    %c112 = arith.constant 112 : index
    %c0_15 = arith.constant 0 : index
    %23 = vector.load %arg3[%c112, %c0_15] : memref<128x128xf32, #tpu.memory_space<vmem>>, vector<16x128xf32>
    %cst_16 = arith.constant dense<0.000000e+00> : vector<16x128xf32>
    %24 = tpu.matmul %22, %21, %cst_16 {dimension_numbers = #tpu.dot_dimension_numbers<[1], [0], [0], [1], [0, 0, 1, 1], [], []>} : vector<16x32xf32>, vector<32x128xf32>, vector<16x128xf32> -> vector<16x128xf32>
    %25 = arith.addf %24, %23 : vector<16x128xf32>
    %26 = arith.negf %25 : vector<16x128xf32>
    %27 = math.exp %26 : vector<16x128xf32>
    %cst_17 = arith.constant 1.000000e+00 : f32
    %28 = vector.broadcast %cst_17 : f32 to vector<16x128xf32>
    %29 = arith.addf %28, %27 : vector<16x128xf32>
    %30 = arith.divf %28, %29 : vector<16x128xf32>
    %c0_18 = arith.constant 0 : index
    %c0_19 = arith.constant 0 : index
    %31 = vector.load %arg4[%c0_18, %c0_19] : memref<16x128xf32, #tpu.memory_space<vmem>>, vector<16x128xf32>
    tpu.vector_store %arg4[%c0_18, %c0_19], %30 {strides = array<i32>} : memref<16x128xf32, #tpu.memory_space<vmem>>, vector<16x128xf32>,
    return
  }
}

</mosaic_0001>

<bundles_post_ra>
// kernel: tpu_custom_call.1
= control target key start
LH: loop header
LB: loop body
LE: loop exit
PB: predicated region body
PF: predicated region fallthrough
CT: control target
= control target key end

     0   :  { %9 = vsyncpa [#allocation3], 0  ;;  %s653_s0 = inlined_call_operand.hbm [shape: f32[128,128], index: 0, kind: input, shape index: {}]   ;;  %s654_s1 = inlined_call_operand.hbm [shape: f32[2,128], index: 1, kind: input, shape index: {}]   ;;  %s655_s2 = inlined_call_operand.hbm [shape: f32[32,128], index: 2, kind: input, shape index: {}]   ;;  %s656_s3 = inlined_call_operand.hbm [shape: f32[128,128], index: 3, kind: input, shape index: {}]   ;;  %s657_s4 = inlined_call_operand.hbm [shape: f32[16,128], index: 4, kind: output, shape index: {}]  }
   0x1   :  { %10 = vsyncpa [#allocation6], 0 }
   0x2   :  { %11 = vsyncpa [#allocation9], 0  ;;  %s31_s17 = sshll.u32 %s654_s1, 4  ;;  %s32_s17 = int_to_ptr.hbm [resolvable:$true] %s31_s17 }
   0x3   :  { %12 = vsyncpa [#allocation4], 0  ;;  %s564_s18 = smov [#allocation5]   ;;  %s17_s22 = sshll.u32 %s653_s0, 4  ;;  %s18_s22 = int_to_ptr.hbm [resolvable:$true] %s17_s22 }
   0x4   :  { %s33_s19 = sshll.u32 %s564_s18, 4  ;;  %s565_s23 = smov [#allocation2]   ;;  %s34_s19 = int_to_ptr.vmem [resolvable:$true] %s33_s19 }
   0x5   :  { %36 = dma.hbm_to_vmem [thread:$0]  %s32_s17, 32, %s34_s19, [#allocation6]  }
   0x6   :  { %s19_s24 = sshll.u32 %s565_s23, 4  ;;  %s566_s25 = smov 128   ;;  %s20_s24 = int_to_ptr.vmem [resolvable:$true] %s19_s24 }
   0x7   :  { %s567_s26 = smov 8   ;;  %s41_s28 = sshll.u32 %s655_s2, 4  ;;  %s42_s28 = int_to_ptr.hbm [resolvable:$true] %s41_s28 }
   0x8   :  { %25 = dma.hbm_to_vmem [thread:$0]  %s18_s22, 2048, %s20_s24, [#allocation3], %s566_s25, %s566_s25, %s567_s26  }
   0x9   :  { %s568_s29 = smov [#allocation7]   ;;  %s54_s6 = sshll.u32 %s656_s3, 4  ;;  %s55_s6 = int_to_ptr.hbm [resolvable:$true] %s54_s6 }
   0xa   :  { %s43_s30 = sshll.u32 %s568_s29, 4  ;;  %s569_s7 = smov [#allocation8]   ;;  %s44_s30 = int_to_ptr.vmem [resolvable:$true] %s43_s30 }
   0xb   :  { %49 = dma.hbm_to_vmem [thread:$0]  %s42_s28, 512, %s44_s30, [#allocation6], %s566_s25, %s566_s25, %s567_s26  }
   0xc   :  { %s56_s8 = sshll.u32 %s569_s7, 4  ;;  %s57_s8 = int_to_ptr.vmem [resolvable:$true] %s56_s8 }
   0xd   :  { %62 = dma.hbm_to_vmem [thread:$0]  %s55_s6, 2048, %s57_s8, [#allocation9], %s566_s25, %s566_s25, %s567_s26  }
   0xe   :  { %556 = dma.done.wait [#allocation3], 2048  }
   0xf   :  { %557 = vsyncadd [#allocation3], 4294965248 }
  0x10   :  { %558 = dma.done.wait [#allocation6], 544  }
  0x11   :  { %559 = vsyncadd [#allocation6], 4294966752 }
  0x12   :  { %560 = dma.done.wait [#allocation9], 2048  }
  0x13   :  { %561 = vsyncadd [#allocation9], 4294965248  ;;  %v94_v0 = vld [vmem:[#allocation2 + $0x78] sm:$0xff]  ;;  %v93_v1 = vld [vmem:[#allocation2 + $0x70] sm:$0xff]  ;;  %vm148_vm0 = vcmask 261120   ;;  %vm226_vm1 = vcmask 523264  }
  0x14   :  { %114 = vmatpush.msra.mxu0 %v94_v0  ;;  %272 = vmatpush.msra.mxu3 %v94_v0  ;;  %v92_v2 = vld [vmem:[#allocation2 + $0x68] sm:$0xff]  ;;  %v91_v3 = vld [vmem:[#allocation2 + $0x60] sm:$0xff]  ;;  %v90_v4 = vld [vmem:[#allocation2 + $0x58] sm:$0xff]  ;;  %s570_s2 = smov [#allocation10]   ;;  %s388_s11 = sshll.u32 %s657_s4, 4  ;;  %s389_s11 = int_to_ptr.hbm [resolvable:$true] %s388_s11 }
  0x15   :  { %v89_v5 = vld [vmem:[#allocation2 + $0x50] sm:$0xff]  ;;  %v88_v6 = vld [vmem:[#allocation2 + $0x48] sm:$0xff]  ;;  %v87_v7 = vld [vmem:[#allocation2 + $0x40] sm:$0xff]  ;;  %s386_s3 = sshll.u32 %s570_s2, 4  ;;  %s387_s3 = int_to_ptr.vmem [resolvable:$true] %s386_s3 }
  0x16   :  { %115 = vmatpush.msra.mxu0 %v93_v1  ;;  %273 = vmatpush.msra.mxu3 %v93_v1  ;;  %v86_v8 = vld [vmem:[#allocation2 + $0x38] sm:$0xff]  ;;  %v85_v9 = vld [vmem:[#allocation2 + $0x30] sm:$0xff]  ;;  %v84_v10 = vld [vmem:[#allocation2 + $0x28] sm:$0xff] }
  0x17   :  { %v83_v11 = vld [vmem:[#allocation2 + $0x20] sm:$0xff]  ;;  %v82_v12 = vld [vmem:[#allocation2 + $0x18] sm:$0xff]  ;;  %v81_v13 = vld [vmem:[#allocation2 + $0x10] sm:$0xff] }
  0x18   :  { %116 = vmatpush.msra.mxu0 %v92_v2  ;;  %274 = vmatpush.msra.mxu3 %v92_v2  ;;  %v617_v14 = vld [vmem:[#allocation5] ss:$0 sm:$0xff]  ;;  %v97_v15 = vld [vmem:[#allocation7] sm:$0xff]  ;;  %v98_v19 = vld [vmem:[#allocation7 + $0x8] sm:$0xff] }
  0x19   :  { %v80_v16 = vld [vmem:[#allocation2 + $0x8] sm:$0xff]  ;;  %v79_v17 = vld [vmem:[#allocation2] sm:$0xff]  ;;  %v110_v18 = vmul.f32 %v617_v14, %v97_v15  ;;  %v111_v20 = vmul.f32 %v617_v14, %v98_v19  ;;  %v99_v21 = vld [vmem:[#allocation7 + $0x10] sm:$0xff] }
  0x1a   :  { %117 = vmatpush.msra.mxu0 %v91_v3  ;;  %275 = vmatpush.msra.mxu3 %v91_v3  ;;  %v112_v22 = vmul.f32 %v617_v14, %v99_v21  ;;  %v100_v23 = vld [vmem:[#allocation7 + $0x18] sm:$0xff]  ;;  %v101_v34 = vld [vmem:[#allocation8] sm:$0xff]  ;;  %v102_v35 = vld [vmem:[#allocation8 + $0x8] sm:$0xff] }
  0x1b   :  { %v113_v24 = vmul.f32 %v617_v14, %v100_v23  ;;  %v623_v28 = vld [vmem:[#allocation5 + $0x1] ss:$0 sm:$0xff]  ;;  %v103_v36 = vld [vmem:[#allocation8 + $0x10] sm:$0xff]  ;;  %v105_v38 = vld [vmem:[#allocation8 + $0x20] sm:$0xff] }
  0x1c   :  { %118 = vmatpush.msra.mxu0 %v90_v4  ;;  %276 = vmatpush.msra.mxu3 %v90_v4  ;;  %v104_v37 = vld [vmem:[#allocation8 + $0x18] sm:$0xff]  ;;  %v106_v39 = vld [vmem:[#allocation8 + $0x28] sm:$0xff]  ;;  %v107_v40 = vld [vmem:[#allocation8 + $0x30] sm:$0xff] }
  0x1d   :  { %v108_v41 = vld [vmem:[#allocation8 + $0x38] sm:$0xff]  ;;  %v222_v58 = vld [vmem:[#allocation8 + $0x40] sm:$0xff]  ;;  %v223_v59 = vld [vmem:[#allocation8 + $0x48] sm:$0xff] }
  0x1e   :  { %119 = vmatpush.msra.mxu0 %v89_v5  ;;  %277 = vmatpush.msra.mxu3 %v89_v5  ;;  %v224_v60 = vld [vmem:[#allocation8 + $0x50] sm:$0xff]  ;;  %v225_v61 = vld [vmem:[#allocation8 + $0x58] sm:$0xff]  ;;  %v310_v19 = vld [vmem:[#allocation8 + $0x68] sm:$0xff] }
  0x20   :  { %120 = vmatpush.msra.mxu0 %v88_v6  ;;  %278 = vmatpush.msra.mxu3 %v88_v6 }
  0x22   :  { %121 = vmatpush.msra.mxu0 %v87_v7  ;;  %279 = vmatpush.msra.mxu3 %v87_v7 }
  0x24   :  { %122 = vmatpush.msra.mxu0 %v86_v8  ;;  %280 = vmatpush.msra.mxu3 %v86_v8 }
  0x26   :  { %123 = vmatpush.msra.mxu0 %v85_v9  ;;  %281 = vmatpush.msra.mxu3 %v85_v9 }
  0x28   :  { %124 = vmatpush.msra.mxu0 %v84_v10  ;;  %282 = vmatpush.msra.mxu3 %v84_v10 }
  0x2a   :  { %125 = vmatpush.msra.mxu0 %v83_v11  ;;  %283 = vmatpush.msra.mxu3 %v83_v11 }
  0x2c   :  { %126 = vmatpush.msra.mxu0 %v82_v12  ;;  %284 = vmatpush.msra.mxu3 %v82_v12 }
  0x2e   :  { %127 = vmatpush.msra.mxu0 %v81_v13  ;;  %285 = vmatpush.msra.mxu3 %v81_v13 }
  0x30   :  { %128 = vmatpush.msra.mxu0 %v80_v16  ;;  %286 = vmatpush.msra.mxu3 %v80_v16 }
  0x32   :  { %129 = vmatpush.msra.mxu0 %v79_v17  ;;  %287 = vmatpush.msra.mxu3 %v79_v17 }
  0x33   :  { %130 = vmatmul.f32.vlgmr.msra.gmra.mxu0 %v110_v18 }
  0x3b   :  { %133 = vmatmul.f32.gmra.mxu0 %v111_v20  ;;  %v311_v20 = vld [vmem:[#allocation8 + $0x70] sm:$0xff] }
  0x43   :  { %136 = vmatmul.f32.gmra.mxu0 %v112_v22 }
  0x4b   :  { %139 = vmatmul.f32.gmra.mxu0 %v113_v24  ;;  %v312_v24 = vld [vmem:[#allocation8 + $0x78] sm:$0xff] }
  0xb0   :  { %v131_v25 = vpop.f32.mrf.mxu0 }
  0xb1   :  { %v144_v33 = vmul.f32 %v623_v28, %v131_v25 }
  0xb8   :  { %v134_v26 = vpop.f32.mrf.mxu0 }
  0xb9   :  { %v145_v32 = vmul.f32 %v623_v28, %v134_v26 }
  0xc0   :  { %v137_v27 = vpop.f32.mrf.mxu0 }
  0xc1   :  { %v146_v31 = vmul.f32 %v623_v28, %v137_v27 }
  0xc8   :  { %v140_v29 = vpop.f32.mrf.mxu0 }
  0xc9   :  { %v147_v30 = vmul.f32 %v623_v28, %v140_v29 }
  0xcb   :  { %185 = vmatpush.msra.mxu1 %v147_v30 }
  0xcd   :  { %186 = vmatpush.msra.mxu1 %v146_v31 }
  0xcf   :  { %187 = vmatpush.msra.mxu1 %v145_v32 }
  0xd1   :  { %188 = vmatpush.msra.mxu1 %v144_v33 }
  0xd2   :  { %403 = vmatmul.msk.f32.vlgmr.msra.gmra.mxu1 %vm148_vm0, %v101_v34 }
  0xda   :  { %404 = vmatmul.msk.f32.gmra.mxu1 %vm148_vm0, %v102_v35 }
  0xe2   :  { %405 = vmatmul.msk.f32.gmra.mxu1 %vm148_vm0, %v103_v36 }
  0xea   :  { %406 = vmatmul.msk.f32.gmra.mxu1 %vm148_vm0, %v104_v37 }
  0xf2   :  { %407 = vmatmul.msk.f32.gmra.mxu1 %vm148_vm0, %v105_v38 }
  0xfa   :  { %408 = vmatmul.msk.f32.gmra.mxu1 %vm148_vm0, %v106_v39 }
 0x102   :  { %409 = vmatmul.msk.f32.gmra.mxu1 %vm148_vm0, %v107_v40 }
 0x10a   :  { %410 = vmatmul.msk.f32.gmra.mxu1 %vm148_vm0, %v108_v41 }
 0x14f   :  { %v190_v42 = vpop.f32.mrf.mxu1 }
 0x150   :  { %v214_v57 = vmax.f32 %v190_v42, 0.0 }
 0x157   :  { %v193_v43 = vpop.f32.mrf.mxu1 }
 0x158   :  { %v215_v56 = vmax.f32 %v193_v43, 0.0 }
 0x15f   :  { %v196_v44 = vpop.f32.mrf.mxu1 }
 0x160   :  { %v216_v55 = vmax.f32 %v196_v44, 0.0 }
 0x167   :  { %v199_v45 = vpop.f32.mrf.mxu1 }
 0x168   :  { %v217_v54 = vmax.f32 %v199_v45, 0.0 }
 0x16f   :  { %v202_v46 = vpop.f32.mrf.mxu1 }
 0x170   :  { %v218_v53 = vmax.f32 %v202_v46, 0.0 }
 0x177   :  { %v205_v47 = vpop.f32.mrf.mxu1 }
 0x178   :  { %v219_v52 = vmax.f32 %v205_v47, 0.0 }
 0x17f   :  { %v208_v48 = vpop.f32.mrf.mxu1 }
 0x180   :  { %v220_v51 = vmax.f32 %v208_v48, 0.0 }
 0x187   :  { %v211_v49 = vpop.f32.mrf.mxu1 }
 0x188   :  { %v221_v50 = vmax.f32 %v211_v49, 0.0 }
 0x18a   :  { %247 = vmatpush.msra.mxu2 %v221_v50 }
 0x18c   :  { %248 = vmatpush.msra.mxu2 %v220_v51 }
 0x18e   :  { %249 = vmatpush.msra.mxu2 %v219_v52 }
 0x190   :  { %250 = vmatpush.msra.mxu2 %v218_v53 }
 0x192   :  { %251 = vmatpush.msra.mxu2 %v217_v54 }
 0x194   :  { %252 = vmatpush.msra.mxu2 %v216_v55 }
 0x196   :  { %253 = vmatpush.msra.mxu2 %v215_v56 }
 0x198   :  { %254 = vmatpush.msra.mxu2 %v214_v57 }
 0x199   :  { %411 = vmatmul.msk.f32.vlgmr.msra.gmra.mxu2 %vm226_vm1, %v222_v58 }
 0x1a1   :  { %412 = vmatmul.msk.f32.gmra.mxu2 %vm226_vm1, %v223_v59 }
 0x1a9   :  { %413 = vmatmul.msk.f32.gmra.mxu2 %vm226_vm1, %v224_v60 }
 0x1b1   :  { %414 = vmatmul.msk.f32.gmra.mxu2 %vm226_vm1, %v225_v61 }
 0x21c   :  { %v256_v62 = vpop.f32.mrf.mxu2 }
 0x21d   :  { %v268_v63 = vmul.f32 %v617_v14, %v256_v62 }
 0x21f   :  { %288 = vmatmul.f32.vlgmr.msra.gmra.mxu3 %v268_v63 }
 0x224   :  { %v259_v0 = vpop.f32.mrf.mxu2 }
 0x225   :  { %v269_v1 = vmul.f32 %v617_v14, %v259_v0 }
 0x227   :  { %291 = vmatmul.f32.gmra.mxu3 %v269_v1 }
 0x22c   :  { %v262_v2 = vpop.f32.mrf.mxu2 }
 0x22d   :  { %v270_v3 = vmul.f32 %v617_v14, %v262_v2 }
 0x22f   :  { %294 = vmatmul.f32.gmra.mxu3 %v270_v3 }
 0x234   :  { %v265_v4 = vpop.f32.mrf.mxu2 }
 0x235   :  { %v271_v5 = vmul.f32 %v617_v14, %v265_v4  ;;  %v309_v14 = vld [vmem:[#allocation8 + $0x60] sm:$0xff] }
 0x237   :  { %297 = vmatmul.f32.gmra.mxu3 %v271_v5 }
 0x2a2   :  { %v289_v6 = vpop.f32.mrf.mxu3 }
 0x2a3   :  { %v301_v15 = vmul.f32 %v623_v28, %v289_v6 }
 0x2a5   :  { %v305_v18 = vmax.f32 %v301_v15, 0.0 }
 0x2aa   :  { %v292_v7 = vpop.f32.mrf.mxu3 }
 0x2ab   :  { %v302_v12 = vmul.f32 %v623_v28, %v292_v7 }
 0x2ad   :  { %v306_v17 = vmax.f32 %v302_v12, 0.0 }
 0x2b2   :  { %v295_v8 = vpop.f32.mrf.mxu3 }
 0x2b3   :  { %v303_v10 = vmul.f32 %v623_v28, %v295_v8 }
 0x2b5   :  { %v307_v16 = vmax.f32 %v303_v10, 0.0 }
 0x2ba   :  { %v298_v9 = vpop.f32.mrf.mxu3 }
 0x2bb   :  { %v304_v11 = vmul.f32 %v623_v28, %v298_v9 }
 0x2bd   :  { %v308_v13 = vmax.f32 %v304_v11, 0.0 }
 0x2bf   :  { %331 = vmatpush.msrb.mxu2 %v308_v13 }
 0x2c1   :  { %332 = vmatpush.msrb.mxu2 %v307_v16 }
 0x2c3   :  { %333 = vmatpush.msrb.mxu2 %v306_v17 }
 0x2c5   :  { %334 = vmatpush.msrb.mxu2 %v305_v18 }
 0x2c6   :  { %415 = vmatmul.msk.f32.vlgmr.msrb.gmra.mxu2 %vm148_vm0, %v309_v14 }
 0x2ce   :  { %416 = vmatmul.msk.f32.gmra.mxu2 %vm148_vm0, %v310_v19 }
 0x349   :  { %v336_v21 = vpop.f32.mrf.mxu2 }
 0x34a   :  { %v337_v22 = vadd.f32 %v336_v21, %v311_v20 }
 0x34c   :  { %v417_v23 = vmul.f32 -1.442695, %v337_v22 }
 0x34e   :  { %428 = vpow2.f32 %v417_v23 }
 0x351   :  { %v339_v25 = vpop.f32.mrf.mxu2 }
 0x352   :  { %v340_v26 = vadd.f32 %v339_v25, %v312_v24 }
 0x354   :  { %v429_v27 = vpop.eup %428  ;;  %v418_v28 = vmul.f32 -1.442695, %v340_v26 }
 0x355   :  { %v348_v29 = vadd.f32 1.0, %v429_v27 }
 0x356   :  { %430 = vpow2.f32 %v418_v28 }
 0x357   :  { %432 = vrcp.f32 %v348_v29  ;;  %v361_v35 = vand.u32 2147483648, %v348_v29  ;;  %v359_v37 = vand.u32 2147483647, %v348_v29  ;;  %vm355_vm3 = vweird.f32 %v348_v29 }
 0x359   :  { %v362_v40 = vor.u32 1.1754944e-38, %v361_v35  ;;  %vm360_vm5 = vcmp.eq.f32.partialorder %v359_v37, 8.507059e+37 }
 0x35c   :  { %v431_v30 = vpop.eup %430 }
 0x35d   :  { %v433_v31 = vpop.eup %432  ;;  %v349_v32 = vadd.f32 1.0, %v431_v30 }
 0x35e   :  { %v351_v33 = vmul.f32 %v433_v31, %v348_v29  ;;  %vm356_vm2 = vweird.f32 %v433_v31 }
 0x35f   :  { %434 = vrcp.f32 %v349_v32  ;;  %vm357_vm4 = vmor %vm355_vm3, %vm356_vm2  ;;  %v376_v45 = vand.u32 2147483648, %v349_v32  ;;  %v374_v47 = vand.u32 2147483647, %v349_v32  ;;  %vm370_vm7 = vweird.f32 %v349_v32 }
 0x360   :  { %v352_v34 = vsub.f32 1.0, %v351_v33 }
 0x361   :  { %v377_v49 = vor.u32 1.1754944e-38, %v376_v45  ;;  %vm375_vm9 = vcmp.eq.f32.partialorder %v374_v47, 8.507059e+37 }
 0x362   :  { %v353_v36 = vmul.f32 %v433_v31, %v352_v34 }
 0x364   :  { %v354_v38 = vadd.f32 %v433_v31, %v353_v36 }
 0x365   :  { %v435_v39 = vpop.eup %434 }
 0x366   :  { %v366_v41 = vmul.f32 %v435_v39, %v349_v32  ;;  %v358_v42 = vsel %vm357_vm4, %v433_v31, %v354_v38  ;;  %vm371_vm6 = vweird.f32 %v435_v39 }
 0x367   :  { %v363_v43 = vsel %vm360_vm5, %v362_v40, %v358_v42  ;;  %vm372_vm8 = vmor %vm370_vm7, %vm371_vm6 }
 0x368   :  { %v367_v44 = vsub.f32 1.0, %v366_v41  ;;  %380 = vst [vmem:[#allocation10] sm:$0xff] %v363_v43 }
 0x36a   :  { %v368_v46 = vmul.f32 %v435_v39, %v367_v44 }
 0x36c   :  { %v369_v48 = vadd.f32 %v435_v39, %v368_v46 }
 0x36e   :  { %v373_v50 = vsel %vm372_vm8, %v435_v39, %v369_v48 }
 0x36f   :  { %v378_v51 = vsel %vm375_vm9, %v377_v49, %v373_v50 }
 0x370   :  { %381 = vst [vmem:[#allocation10 + $0x8] sm:$0xff] %v378_v51 }
 0x371   :  { %394 = dma.vmem_to_hbm [thread:$0]  %s387_s3, 256, %s389_s11, [#allocation4], %s566_s25, %s566_s25, %s567_s26  }
 0x372   :  { %562 = dma.done.wait [#allocation4], 256  }
 0x373   :  { %563 = vsyncadd [#allocation4], 4294967040 }
 0x374   :  { %399 = vsyncpa [#allocation3], 1 }
 0x375   :  { %400 = vsyncpa [#allocation6], 1 }
 0x376   :  { %401 = vsyncpa [#allocation9], 1 }
 0x377   :  { %402 = vsyncpa [#allocation4], 1 }

</bundles_post_ra>
